<compile_context>
chip_gen: v5e
topology: v5e:2x2
jax: 0.10.0
libtpu: 0.0.40
codegen_flags: <defaults>
</compile_context>

<pallas_src>
from functools import partial

import jax
import jax.numpy as jnp
from jax import lax
from jax.experimental import pallas as pl
from jax.experimental.pallas import tpu as pltpu

_LANE = 128
_SUBLANE = 8
_BLOCK_BYTES = 4 * 1024 * 1024  # ~4 MiB per block per buffer


def _make_gelu_kernel(approximate, compute_dtype):
    if approximate == "tanh":
        def kernel(x_ref, o_ref):
            x = x_ref[...].astype(compute_dtype)
            c0 = jnp.asarray(0.7978845608028654, compute_dtype)   # sqrt(2/pi)
            c1 = jnp.asarray(0.044715, compute_dtype)
            half = jnp.asarray(0.5, compute_dtype)
            inner = c0 * (x + c1 * x * x * x)
            y = half * x * (1.0 + jnp.tanh(inner))                # tanh -> EUP
            o_ref[...] = y.astype(o_ref.dtype)
    else:
        def kernel(x_ref, o_ref):
            # exact GELU: x * 0.5 * (1 + erf(x / sqrt(2))) -- PyTorch default
            xf = x_ref[...].astype(jnp.float32)
            inv_sqrt2 = jnp.float32(0.7071067811865476)
            y = xf * 0.5 * (1.0 + lax.erf(xf * inv_sqrt2))
            o_ref[...] = y.astype(o_ref.dtype)
    return kernel


@partial(jax.jit, static_argnames=("block_rows", "approximate"))
def gelu_pallas(x, *, block_rows=None, approximate="none"):
    """GELU via a Pallas TPU kernel. Works for arbitrary input shapes.

    approximate="none"  -> exact erf GELU (matches torch.nn.functional.gelu).
    approximate="tanh"  -> tanh approximation (matches gelu(approximate="tanh"));
                           faster on v7x / bf16 since tanh uses the EUP slot.
    """
    if approximate not in ("none", "tanh"):
        raise ValueError(f"unknown approximate mode: {approximate!r}")

    orig_shape = x.shape
    orig_dtype = x.dtype
    n = x.size
    if n == 0:
        return x

    flat = jnp.ravel(x)
    padded = (n % _LANE) != 0
    if padded:
        # Ragged flat length: pad up to a lane multiple (gelu(0) == 0; the
        # tail is sliced off afterwards).  Under jit the pad / slice fuse
        # with the surrounding reshapes instead of extra HBM passes.
        n_pad = pl.cdiv(n, _LANE) * _LANE
        flat = jnp.pad(flat, (0, n_pad - n))
    else:
        n_pad = n
    rows = n_pad // _LANE
    slab = flat.reshape(rows, _LANE)

    # Sublane alignment: f32 -> 8-row tiles, bf16 packs 2 rows -> 16.
    sub = 16 if orig_dtype == jnp.bfloat16 else _SUBLANE
    itemsize = jnp.dtype(orig_dtype).itemsize

    if block_rows is None:
        # ~4 MiB blocks: 8192 rows for f32, 16384 for bf16.
        block_rows = max((_BLOCK_BYTES // (_LANE * itemsize)) // sub * sub, sub)

    # Pick block size: aim for >= 2-4 grid steps (pipelining + megacore
    # sharding on v7x) while capping at block_rows.  Ragged last block is
    # masked by Pallas (elementwise op -> padding is benign).
    if rows >= 2 * sub:
        steps = min(4, rows // sub)
        br = min(block_rows, pl.cdiv(rows, steps))
        br = max((br // sub) * sub, sub)
    else:
        # Tiny input: one block equal to the full array dims (always legal).
        br = rows
    grid = pl.cdiv(rows, br)

    if approximate == "tanh":
        compute_dtype = jnp.bfloat16 if orig_dtype == jnp.bfloat16 else jnp.float32
        cost = pl.CostEstimate(
            flops=10 * n, transcendentals=n, bytes_accessed=2 * n * itemsize)
    else:
        compute_dtype = jnp.float32
        # exact erf lowers to a VALU rational polynomial, not an EUP op
        cost = pl.CostEstimate(
            flops=25 * n, transcendentals=0, bytes_accessed=2 * n * itemsize)

    kernel = _make_gelu_kernel(approximate, compute_dtype)

    out = pl.pallas_call(
        kernel,
        out_shape=jax.ShapeDtypeStruct((rows, _LANE), orig_dtype),
        grid_spec=pltpu.PrefetchScalarGridSpec(
            num_scalar_prefetch=0,
            grid=(grid,),
            in_specs=[pl.BlockSpec((br, _LANE), lambda i: (i, 0))],
            out_specs=pl.BlockSpec((br, _LANE), lambda i: (i, 0)),
        ),
        compiler_params=pltpu.CompilerParams(
            dimension_semantics=("parallel",),
            # ~4 MiB blocks x 2 refs x 2 buffers = ~16 MiB; 40 MiB scoped
            # limit keeps headroom on v7x (64 MiB physical) and is cheap on
            # v5e/v6e (128 MiB physical).
            vmem_limit_bytes=40 * 1024 * 1024,
        ),
        cost_estimate=cost,
    )(slab)

    if padded:
        return out.reshape(-1)[:n].reshape(orig_shape)
    return out.reshape(orig_shape)


def _gelu_ref(x):
    xf = x.astype(jnp.float32)
    return (xf * 0.5 * (1.0 + lax.erf(xf / jnp.sqrt(2.0)))).astype(x.dtype)


if __name__ == "__main__":
    key = jax.random.PRNGKey(0)
    k1, k2, k3 = jax.random.split(key, 3)

    # 1) Primary case matching the module spec: f32, lane-aligned size.
    x = jax.random.normal(k1, (2, 4, 16, 16), dtype=jnp.float32)
    y = gelu_pallas(x)
    jax.block_until_ready(y)
    y_ref = _gelu_ref(x)
    assert y.shape == x.shape and y.dtype == x.dtype
    assert jnp.allclose(y, y_ref, atol=1e-6, rtol=1e-6), "f32 mismatch"

    # 2) Ragged f32 (n % 128 != 0) exercises the padded path.
    xr = jax.random.normal(k2, (1000,), dtype=jnp.float32)
    yr = gelu_pallas(xr)
    jax.block_until_ready(yr)
    assert yr.shape == xr.shape
    assert jnp.allclose(yr, _gelu_ref(xr), atol=1e-6, rtol=1e-6), "ragged mismatch"

    # 3) bf16, ragged -> sub=16 rounding + padded path; exact-erf in f32.
    xb = jax.random.normal(k3, (3, 250), dtype=jnp.bfloat16)
    yb = gelu_pallas(xb)
    jax.block_until_ready(yb)
    assert yb.shape == xb.shape and yb.dtype == jnp.bfloat16
    assert jnp.allclose(yb.astype(jnp.float32), _gelu_ref(xb).astype(jnp.float32),
                        atol=2e-2, rtol=2e-2), "bf16 mismatch"

    # 4) Opt-in tanh-approx path (EUP); close to, but not bit-equal with, erf.
    yt = gelu_pallas(x, approximate="tanh")
    jax.block_until_ready(yt)
    assert jnp.allclose(yt, y_ref, atol=5e-3, rtol=5e-3), "tanh-approx mismatch"

    print("KERNEL_OK")
</pallas_src>

<mosaic_0001>
module attributes {stable_mosaic.version = 11 : i64} {
  func.func @kernel(%arg0: i32, %arg1: memref<8x128xf32, #tpu.memory_space<vmem>>, %arg2: memref<8x128xf32, #tpu.memory_space<vmem>>) attributes {dimension_semantics = [#tpu.dimension_semantics<parallel>], iteration_bounds = array<i64: 2>, scalar_prefetch = 0 : i64, scratch_operands = 0 : i64, tpu.core_type = #tpu.core_type<tc>, window_params = [{transform_indices = @transform_0, window_bounds = array<i64: 8, 128>}, {transform_indices = @transform_1, window_bounds = array<i64: 8, 128>}]} {
    %c0 = arith.constant 0 : index
    %c0_0 = arith.constant 0 : index
    %0 = vector.load %arg1[%c0, %c0_0] : memref<8x128xf32, #tpu.memory_space<vmem>>, vector<8x128xf32>
    %cst = arith.constant 5.000000e-01 : f32
    %1 = vector.broadcast %cst : f32 to vector<8x128xf32>
    %2 = arith.mulf %0, %1 : vector<8x128xf32>
    %cst_1 = arith.constant 0.707106769 : f32
    %3 = vector.broadcast %cst_1 : f32 to vector<8x128xf32>
    %4 = arith.mulf %0, %3 : vector<8x128xf32>
    %5 = math.erf %4 : vector<8x128xf32>
    %cst_2 = arith.constant 1.000000e+00 : f32
    %6 = vector.broadcast %cst_2 : f32 to vector<8x128xf32>
    %7 = arith.addf %6, %5 : vector<8x128xf32>
    %8 = arith.mulf %2, %7 : vector<8x128xf32>
    %c0_3 = arith.constant 0 : index
    %c0_4 = arith.constant 0 : index
    %9 = vector.load %arg2[%c0_3, %c0_4] : memref<8x128xf32, #tpu.memory_space<vmem>>, vector<8x128xf32>
    tpu.vector_store %arg2[%c0_3, %c0_4], %8 {strides = array<i32>} : memref<8x128xf32, #tpu.memory_space<vmem>>, vector<8x128xf32>,
    return
  }
  func.func @transform_0(%arg0: i32) -> (i32, i32) {
    %c0_i32 = arith.constant 0 : i32
    %c0_i32_0 = arith.constant 0 : i32
    return %arg0, %c0_i32 : i32, i32
  }
  func.func @transform_1(%arg0: i32) -> (i32, i32) {
    %c0_i32 = arith.constant 0 : i32
    %c0_i32_0 = arith.constant 0 : i32
    return %arg0, %c0_i32 : i32, i32
  }
}

</mosaic_0001>

<bundles_post_ra>
// kernel: gelu_pallas.1
= control target key start
LH: loop header
LB: loop body
LE: loop exit
PB: predicated region body
PF: predicated region fallthrough
CT: control target
= control target key end

     0   :  { %s249_s6 = smov 0   ;;  %s273_s0 = inlined_call_operand.vmem [shape: f32[16,128], index: 0, kind: input, shape index: {}]   ;;  %s274_s1 = inlined_call_operand.vmem [shape: f32[16,128], index: 1, kind: output, shape index: {}]  }
   0x1 LB: > { %s211_s7 = sadd.s32 4294967295, %s237_s6   ;;  %p215_p0 = scmp.ge.s32.totalorder %s237_s6, 1  ;;  %s237_s6 = sphi %s249_s6, %s11_s6  }
   0x2   : > { %p86_p1 = scmp.lt.s32.totalorder %s237_s6, 3 }
   0x4   : > { %p87_p2 = pnand %p215_p0, %p86_p1 }
   0x5   : > { %p104_p3 = scmp.lt.s32.totalorder (!%p87_p2), %s211_s7, 1 }
   0x6   : > { %90 = sbr.rel (%p87_p2) target bundleno = 67 (0x43), region = 24 }
   0xb   : > { %s276_s7 = smov (!%p104_p3, %s211_s7), 1 }
   0xc   : > { %s216_s8 = sshll.u32 %s276_s7, 3 }
   0xd   : > { %s107_s11 = scalar_lea.vmem %s273_s0, %s216_s8  ;;  %s111_s14 = scalar_lea.vmem %s274_s1, %s216_s8 }
   0xe   : > { %v112_v0 = vld [vmem:[%s107_s11] sm:$0xff] }
   0xf   : > { %v114_v1 = vmul.f32 0.70710677, %v112_v0  ;;  %v113_v36 = vmul.f32 0.5, %v112_v0 }
  0x11   : > { %v115_v2 = vmul.f32 %v114_v1, %v114_v1 }
  0x13   : > { %v116_v3 = vmin.f32 %v115_v2, 16.0 }
  0x15   : > { %v117_v4 = vmul.f32 2.1237322e-06, %v116_v3  ;;  %v128_v5 = vmul.f32 3.8918573e-05, %v116_v3 }
  0x17   : > { %v118_v6 = vadd.f32 0.00028619796, %v117_v4  ;;  %v129_v7 = vadd.f32 0.001143296, %v128_v5 }
  0x19   : > { %v119_v8 = vmul.f32 %v118_v6, %v116_v3  ;;  %v130_v9 = vmul.f32 %v129_v7, %v116_v3 }
  0x1b   : > { %v120_v10 = vadd.f32 0.0036580483, %v119_v8  ;;  %v131_v11 = vadd.f32 0.014752088, %v130_v9 }
  0x1d   : > { %v121_v12 = vmul.f32 %v120_v10, %v116_v3  ;;  %v132_v13 = vmul.f32 %v131_v11, %v116_v3 }
  0x1f   : > { %v133_v14 = vadd.f32 0.112945676, %v132_v13  ;;  %v122_v15 = vadd.f32 0.05243302, %v121_v12 }
  0x21   : > { %v134_v16 = vmul.f32 %v133_v14, %v116_v3  ;;  %v123_v18 = vmul.f32 %v122_v15, %v116_v3 }
  0x23   : > { %v135_v17 = vadd.f32 0.4994258, %v134_v16  ;;  %v124_v21 = vadd.f32 0.18741608, %v123_v18 }
  0x25   : > { %v136_v19 = vmul.f32 %v135_v17, %v116_v3  ;;  %v125_v22 = vmul.f32 %v124_v21, %v116_v3 }
  0x27   : > { %v137_v20 = vadd.f32 1.0, %v136_v19  ;;  %v126_v25 = vadd.f32 1.1283791, %v125_v22 }
  0x29   : > { %229 = vrcp.f32 %v137_v20  ;;  %v149_v26 = vand.u32 2147483648, %v137_v20  ;;  %vm143_vm0 = vweird.f32 %v137_v20  ;;  %v147_v28 = vand.u32 2147483647, %v137_v20 }
  0x2a   : > { %v127_v31 = vmul.f32 %v126_v25, %v114_v1 }
  0x2b   : > { %v150_v30 = vor.u32 1.1754944e-38, %v149_v26  ;;  %vm148_vm3 = vcmp.eq.f32.partialorder %v147_v28, 8.507059e+37 }
  0x2f   : > { %v230_v23 = vpop.eup %229 }
  0x30   : > { %v139_v24 = vmul.f32 %v230_v23, %v137_v20  ;;  %vm144_vm1 = vweird.f32 %v230_v23 }
  0x31   : > { %vm145_vm2 = vmor %vm143_vm0, %vm144_vm1 }
  0x32   : > { %v140_v27 = vsub.f32 1.0, %v139_v24 }
  0x34   : > { %v141_v29 = vmul.f32 %v230_v23, %v140_v27 }
  0x36   : > { %v142_v32 = vadd.f32 %v230_v23, %v141_v29 }
  0x38   : > { %v146_v33 = vsel %vm145_vm2, %v230_v23, %v142_v32 }
  0x39   : > { %v151_v34 = vsel %vm148_vm3, %v150_v30, %v146_v33 }
  0x3a   : > { %v152_v35 = vmul.f32 %v151_v34, %v127_v31 }
  0x3c   : > { %v218_v37 = vclamps-f32 %v152_v35, 1.0 }
  0x3e   : > { %v155_v38 = vadd.f32 1.0, %v218_v37 }
  0x40   : > { %v156_v39 = vmul.f32 %v155_v38, %v113_v36 }
  0x42   : > { %157 = vst [vmem:[%s111_s14] sm:$0xff] %v156_v39 }
  0x43 PF: > { %s11_s6 = sadd.s32 1, %s237_s6  }
  0x44   : > { %p8_p4 = scmp.ge.s32.totalorder %s11_s6, 4  }
  0x46   :  { %10 = sbr.rel (!%p8_p4) target bundleno = 1 (0x1), region = 54 }

</bundles_post_ra>
